<compile_context>
chip_gen: v7x
topology: tpu7x:2x2x1
jax: 0.10.0
libtpu: 0.0.40
codegen_flags: <defaults>
</compile_context>

<pallas_src>
import jax
import jax.numpy as jnp
from jax.experimental import pallas as pl
from jax.experimental.pallas import tpu as pltpu

_LANE = 128
_SUBLANE = 8


def _round_up(v, m):
    return ((v + m - 1) // m) * m


def _padded_bytes(rows, cols, itemsize=4):
    # f32 VMEM footprint of a (rows, cols) block after (8, 128) layout padding.
    return _round_up(max(rows, 1), _SUBLANE) * _round_up(max(cols, 1), _LANE) * itemsize


def _mlp_kernel(x_ref, w1_ref, b1_ref, w2_ref, b2_ref, o_ref):
    # layer 1: x @ W1 + b1, fused ReLU (f32 accumulation on the MXU)
    h = jnp.dot(x_ref[...], w1_ref[...], preferred_element_type=jnp.float32)
    h = jnp.maximum(h + b1_ref[...], 0.0)
    # layer 2: h @ W2 + b2 -> narrow (tb, 5) output block (full-array last dim)
    y = jnp.dot(h, w2_ref[...], preferred_element_type=jnp.float32) + b2_ref[...]
    o_ref[...] = y.astype(o_ref.dtype)


def toy_model_forward(x, w1, b1, w2, b2, *, block_batch=4096):
    """x: (B, 10), w1: (10, 10), b1: (1, 10), w2: (10, 5), b2: (1, 5) -> (B, 5)."""
    B, in_f = x.shape
    hidden = w1.shape[1]
    out_f = w2.shape[1]

    # Batch tile: multiple of 8 sublanes, no larger than the (sublane-rounded) batch.
    tb = min(block_batch, _round_up(B, _SUBLANE))
    # Ensure >= 2 grid steps when the batch allows it, so both v7x TensorCores
    # (dimension_semantics="parallel") get work. Harmless on single-TC v5e/v6e.
    if B >= 2 * _SUBLANE:
        tb = min(tb, _round_up(pl.cdiv(B, 2), _SUBLANE))
    tb = max(_SUBLANE, _round_up(tb, _SUBLANE))

    grid = (pl.cdiv(B, tb),)

    # VMEM budget from layout-padded footprints, double-buffered streamed blocks.
    x_tile = _padded_bytes(tb, in_f)
    o_tile = _padded_bytes(tb, out_f)
    w_bytes = (_padded_bytes(in_f, hidden) + _padded_bytes(1, hidden)
               + _padded_bytes(hidden, out_f) + _padded_bytes(1, out_f))
    needed = 2 * (x_tile + o_tile + w_bytes)          # 2-deep pipelining
    vmem_limit = int(min(max(2 * needed, 8 << 20), 48 << 20))  # headroom, < 64 MiB

    out = pl.pallas_call(
        _mlp_kernel,
        out_shape=jax.ShapeDtypeStruct((B, out_f), x.dtype),
        grid=grid,
        in_specs=[
            pl.BlockSpec((tb, in_f), lambda i: (i, 0)),      # x: streamed by batch tile
            pl.BlockSpec((in_f, hidden), lambda i: (0, 0)),  # W1: VMEM-resident
            pl.BlockSpec((1, hidden), lambda i: (0, 0)),     # b1: VMEM-resident
            pl.BlockSpec((hidden, out_f), lambda i: (0, 0)), # W2: VMEM-resident
            pl.BlockSpec((1, out_f), lambda i: (0, 0)),      # b2: VMEM-resident
        ],
        out_specs=pl.BlockSpec((tb, out_f), lambda i: (i, 0)),
        compiler_params=pltpu.CompilerParams(
            dimension_semantics=("parallel",),   # megacore sharding on v7x
            vmem_limit_bytes=vmem_limit,
        ),
    )(x, w1, b1, w2, b2)
    return out


def init_toy_model_params(key):
    """Deterministic init mimicking PyTorch nn.Linear default:
    U(-1/sqrt(fan_in), 1/sqrt(fan_in)) for both weight and bias.
    Weights are stored (in_features, out_features) -- transposed vs. PyTorch --
    once here, so there is no per-call layout plumbing."""
    k1, k2, k3, k4 = jax.random.split(key, 4)
    in1, out1 = 10, 10
    in2, out2 = 10, 5
    bound1 = 1.0 / jnp.sqrt(in1)
    bound2 = 1.0 / jnp.sqrt(in2)
    w1 = jax.random.uniform(k1, (in1, out1), jnp.float32, -bound1, bound1)
    b1 = jax.random.uniform(k2, (1, out1), jnp.float32, -bound1, bound1)
    w2 = jax.random.uniform(k3, (in2, out2), jnp.float32, -bound2, bound2)
    b2 = jax.random.uniform(k4, (1, out2), jnp.float32, -bound2, bound2)
    return w1, b1, w2, b2


def _reference(x, w1, b1, w2, b2):
    return jnp.maximum(x @ w1 + b1, 0.0) @ w2 + b2


if __name__ == "__main__":
    key = jax.random.PRNGKey(0)
    kx, kp = jax.random.split(key)
    w1, b1, w2, b2 = init_toy_model_params(kp)

    # Small batch: single grid step.
    batch = 8
    x = jax.random.normal(kx, (batch, 10), jnp.float32)
    out = jax.block_until_ready(toy_model_forward(x, w1, b1, w2, b2))
    ref = _reference(x, w1, b1, w2, b2)
    assert out.shape == (batch, 5)
    assert jnp.allclose(out, ref, atol=1e-5, rtol=1e-5)

    # Ragged final block handled by Pallas (B=40, tb=16 -> 3 grid steps, last one ragged).
    batch2 = 40
    x2 = jax.random.normal(kx, (batch2, 10), jnp.float32)
    out2 = jax.block_until_ready(
        toy_model_forward(x2, w1, b1, w2, b2, block_batch=16))
    ref2 = _reference(x2, w1, b1, w2, b2)
    assert out2.shape == (batch2, 5)
    assert jnp.allclose(out2, ref2, atol=1e-5, rtol=1e-5)

    # Sub-sublane batch (B < 8): single padded block, writes past B dropped.
    batch3 = 5
    x3 = jax.random.normal(kx, (batch3, 10), jnp.float32)
    out3 = jax.block_until_ready(toy_model_forward(x3, w1, b1, w2, b2))
    ref3 = _reference(x3, w1, b1, w2, b2)
    assert out3.shape == (batch3, 5)
    assert jnp.allclose(out3, ref3, atol=1e-5, rtol=1e-5)

    print("KERNEL_OK")
</pallas_src>

<mosaic_0001>
module attributes {stable_mosaic.version = 11 : i64} {
  func.func @_mlp_kernel(%arg0: i32, %arg1: memref<8x10xf32, #tpu.memory_space<vmem>>, %arg2: memref<10x10xf32, #tpu.memory_space<vmem>>, %arg3: memref<1x10xf32, #tpu.memory_space<vmem>>, %arg4: memref<10x5xf32, #tpu.memory_space<vmem>>, %arg5: memref<1x5xf32, #tpu.memory_space<vmem>>, %arg6: memref<8x5xf32, #tpu.memory_space<vmem>>) attributes {dimension_semantics = [#tpu.dimension_semantics<parallel>], iteration_bounds = array<i64: 1>, scalar_prefetch = 0 : i64, scratch_operands = 0 : i64, tpu.core_type = #tpu.core_type<tc>, window_params = [{transform_indices = @transform_0, window_bounds = array<i64: 8, 10>}, {pipeline_mode = #tpu.pipeline_mode<synchronous>, transform_indices = @transform_1, window_bounds = array<i64: 10, 10>}, {pipeline_mode = #tpu.pipeline_mode<synchronous>, transform_indices = @transform_2, window_bounds = array<i64: 1, 10>}, {pipeline_mode = #tpu.pipeline_mode<synchronous>, transform_indices = @transform_3, window_bounds = array<i64: 10, 5>}, {pipeline_mode = #tpu.pipeline_mode<synchronous>, transform_indices = @transform_4, window_bounds = array<i64: 1, 5>}, {transform_indices = @transform_5, window_bounds = array<i64: 8, 5>}]} {
    %c0 = arith.constant 0 : index
    %c0_0 = arith.constant 0 : index
    %0 = vector.load %arg1[%c0, %c0_0] : memref<8x10xf32, #tpu.memory_space<vmem>>, vector<8x10xf32>
    %c0_1 = arith.constant 0 : index
    %c0_2 = arith.constant 0 : index
    %1 = vector.load %arg2[%c0_1, %c0_2] : memref<10x10xf32, #tpu.memory_space<vmem>>, vector<10x10xf32>
    %cst = arith.constant dense<0.000000e+00> : vector<8x10xf32>
    %2 = tpu.matmul %0, %1, %cst {dimension_numbers = #tpu.dot_dimension_numbers<[1], [0], [0], [1], [0, 0, 1, 1], [], []>} : vector<8x10xf32>, vector<10x10xf32>, vector<8x10xf32> -> vector<8x10xf32>
    %c0_3 = arith.constant 0 : index
    %c0_4 = arith.constant 0 : index
    %3 = vector.load %arg3[%c0_3, %c0_4] : memref<1x10xf32, #tpu.memory_space<vmem>>, vector<1x10xf32>
    %4 = vector.broadcast %3 : vector<1x10xf32> to vector<8x10xf32>
    %5 = arith.addf %2, %4 : vector<8x10xf32>
    %cst_5 = arith.constant 0.000000e+00 : f32
    %6 = vector.broadcast %cst_5 : f32 to vector<8x10xf32>
    %7 = arith.maximumf %5, %6 : vector<8x10xf32>
    %c0_6 = arith.constant 0 : index
    %c0_7 = arith.constant 0 : index
    %8 = vector.load %arg4[%c0_6, %c0_7] : memref<10x5xf32, #tpu.memory_space<vmem>>, vector<10x5xf32>
    %cst_8 = arith.constant dense<0.000000e+00> : vector<8x5xf32>
    %9 = tpu.matmul %7, %8, %cst_8 {dimension_numbers = #tpu.dot_dimension_numbers<[1], [0], [0], [1], [0, 0, 1, 1], [], []>} : vector<8x10xf32>, vector<10x5xf32>, vector<8x5xf32> -> vector<8x5xf32>
    %c0_9 = arith.constant 0 : index
    %c0_10 = arith.constant 0 : index
    %10 = vector.load %arg5[%c0_9, %c0_10] : memref<1x5xf32, #tpu.memory_space<vmem>>, vector<1x5xf32>
    %11 = vector.broadcast %10 : vector<1x5xf32> to vector<8x5xf32>
    %12 = arith.addf %9, %11 : vector<8x5xf32>
    %c0_11 = arith.constant 0 : index
    %c0_12 = arith.constant 0 : index
    %13 = vector.load %arg6[%c0_11, %c0_12] : memref<8x5xf32, #tpu.memory_space<vmem>>, vector<8x5xf32>
    tpu.vector_store %arg6[%c0_11, %c0_12], %12 {strides = array<i32>} : memref<8x5xf32, #tpu.memory_space<vmem>>, vector<8x5xf32>,
    return
  }
  func.func @transform_0(%arg0: i32) -> (i32, i32) {
    %c0_i32 = arith.constant 0 : i32
    %c0_i32_0 = arith.constant 0 : i32
    return %arg0, %c0_i32 : i32, i32
  }
  func.func @transform_1(%arg0: i32) -> (i32, i32) {
    %c0_i32 = arith.constant 0 : i32
    %c0_i32_0 = arith.constant 0 : i32
    %c0_i32_1 = arith.constant 0 : i32
    return %c0_i32, %c0_i32_0 : i32, i32
  }
  func.func @transform_2(%arg0: i32) -> (i32, i32) {
    %c0_i32 = arith.constant 0 : i32
    %c0_i32_0 = arith.constant 0 : i32
    %c0_i32_1 = arith.constant 0 : i32
    return %c0_i32, %c0_i32_0 : i32, i32
  }
  func.func @transform_3(%arg0: i32) -> (i32, i32) {
    %c0_i32 = arith.constant 0 : i32
    %c0_i32_0 = arith.constant 0 : i32
    %c0_i32_1 = arith.constant 0 : i32
    return %c0_i32, %c0_i32_0 : i32, i32
  }
  func.func @transform_4(%arg0: i32) -> (i32, i32) {
    %c0_i32 = arith.constant 0 : i32
    %c0_i32_0 = arith.constant 0 : i32
    %c0_i32_1 = arith.constant 0 : i32
    return %c0_i32, %c0_i32_0 : i32, i32
  }
  func.func @transform_5(%arg0: i32) -> (i32, i32) {
    %c0_i32 = arith.constant 0 : i32
    %c0_i32_0 = arith.constant 0 : i32
    return %arg0, %c0_i32 : i32, i32
  }
}

</mosaic_0001>

<bundles_post_ra>
// kernel: tpu_custom_call.1
= control target key start
LH: loop header
LB: loop body
LE: loop exit
PB: predicated region body
PF: predicated region fallthrough
CT: control target
= control target key end

     0   :  { %vm35_vm0 = vcmask 1041408   ;;  %v274_v2 = vmov 0.0|0.0   ;;  %vm275_vm1 = vmmov 1   ;;  %vm276_vm3 = vmmov 0   ;;  %s342_s0 = inlined_call_operand.vmem [shape: f32[8,10], index: 0, kind: input, shape index: {}]   ;;  %s343_s1 = inlined_call_operand.vmem [shape: f32[10,10], index: 1, kind: input, shape index: {}]   ;;  %s344_s2 = inlined_call_operand.vmem [shape: f32[1,10], index: 2, kind: input, shape index: {}]   ;;  %s345_s3 = inlined_call_operand.vmem [shape: f32[10,5], index: 3, kind: input, shape index: {}]   ;;  %s346_s4 = inlined_call_operand.vmem [shape: f32[1,5], index: 4, kind: input, shape index: {}]   ;;  %s347_s5 = inlined_call_operand.hbm [shape: f32[8,5], index: 5, kind: output, shape index: {}]  }
   0x1   :  { %v22_v0 = vld [vmem:[%s343_s1] sm:$0xff]  ;;  %v23_v1 = vld [vmem:[%s343_s1 + $0x8] sm:$0x3]  ;;  %237 = vmatprep.subr.bf16.mxu0 %v274_v2  ;;  %vm239_vm2 = vmpackc.low %vm35_vm0, %vm275_vm1  ;;  %241 = vmatprep.subr.bf16.mxu1 %v274_v2  ;;  %v277_v4 = vmov 0.0  }
   0x2   :  { %v238_v3 = vpack.c.bf16 %v23_v1, %v22_v0  ;;  %227 = vmatprep.mubr.msk.f32.mxu0 %vm276_vm3, %v277_v4  ;;  %234 = vmatprep.mubr.msk.f32.mxu1 %vm276_vm3, %v277_v4 }
   0x3   :  { %10 = vsyncpa [#allocation3], 0  ;;  %v21_v5 = vld [vmem:[%s342_s0] sm:$0xff]  ;;  %vm31_vm4 = vcmask 80896   ;;  %v111_v7 = vld [vmem:[%s345_s3 + $0x8] sm:$0x3] }
   0x4   :  { %240 = vmatpush3.bf16.msk.msra.mxu0 %vm239_vm2, %v238_v3  ;;  %v110_v6 = vld [vmem:[%s345_s3] sm:$0xff]  ;;  %s278_s30 = smov [#allocation2]   ;;  %vm195_vm5 = vcmask 39936  }
   0x5   :  { %v242_v8 = vpack.c.bf16 %v111_v7, %v110_v6  ;;  %v211_v9 = vld [vmem:[%s344_s2] ss:$0 sm:$0xff]  ;;  %s203_s6 = sshll.u32 %s278_s30, 4  ;;  %s204_s6 = int_to_ptr.vmem [resolvable:$true] %s203_s6 }
   0x6   :  { %v214_v14 = vld [vmem:[%s346_s4] ss:$0 sm:$0xff]  ;;  %s250_s3 = scalar_lea.vmem %s204_s6, 128  ;;  %p255_p1 = scmp.lt.s32.totalorder %s204_s6, %s204_s6 }
   0x7   :  { %228 = vmatmul.mubr.msk.f32.vlgmr.msra.gmra.mrb[0].mxu0 %vm31_vm4, %v21_v5  ;;  %244 = vmatpush3.bf16.msk.msra.mxu1 %vm239_vm2, %v242_v8  ;;  %p251_p0 = scmp.ne.s32.totalorder %s204_s6, %s250_s3  ;;  %p256_p2 = scmp.lt.s32.totalorder %s250_s3, %s250_s3 }
   0x9   :  { %p257_p3 = por %p256_p2, %p255_p1 }
   0xb   :  { %p258_p4 = pnand %p257_p3, %p251_p0 }
  0xda   :  { %v105_v10 = vpop.f32.mrb[0].mxu0 }
  0xdb   :  { %v106_v11 = vadd.f32 %v211_v9, %v105_v10  ;;  %v229_v12 = vpop.f32.mrb[1].mxu0 }
  0xdd   :  { %v109_v13 = vmax.f32 %v106_v11, 0.0 }
  0xdf   :  { %235 = vmatmul.mubr.msk.f32.vlgmr.msra.gmra.mrb[0].mxu1 %vm31_vm4, %v109_v13 }
 0x1b2   :  { %v191_v15 = vpop.f32.mrb[0].mxu1 }
 0x1b3   :  { %v192_v16 = vadd.f32 %v214_v14, %v191_v15  ;;  %v236_v17 = vpop.f32.mrb[1].mxu1 }
 0x1b5   :  { %196 = vst.msk [vmem:[#allocation2] sm:$0xff] %vm195_vm5, %v192_v16 }
 0x1b6   :  { %261 = shalt.err (!%p258_p4)
}
 0x1b7   :  { %s262_s8 = scalar_lea.hbm %s347_s5, 128 }
 0x1b8   :  { %p263_p5 = scmp.ne.s32.totalorder %s347_s5, %s262_s8  ;;  %p266_p6 = scmp.lt.u32.totalorder %s262_s8, %s347_s5 }
 0x1ba   :  { %p268_p7 = pnand %p266_p6, %p263_p5 }
 0x1bc   :  { %271 = shalt.err (!%p268_p7)
}
 0x1bd   :  { %206 = dma.vmem_to_hbm [thread:$0]  %s204_s6, 128, %s347_s5, [#allocation3]  }
 0x1be   :  { %272 = dma.done.wait [#allocation3], 128  }
 0x1bf   :  { %273 = vsyncadd [#allocation3], 4294967168 }
 0x1c0   :  { %210 = vsyncpa [#allocation3], 1 }

</bundles_post_ra>
